<compile_context>
chip_gen: v7x
topology: tpu7x:2x2x1
jax: 0.10.0
libtpu: 0.0.40
codegen_flags: <defaults>
</compile_context>

<pallas_src>
import math
import functools

import jax
import jax.numpy as jnp
from jax.experimental import pallas as pl
from jax.experimental.pallas import tpu as pltpu


# ----------------------------------------------------------------------------
# Kernel body
# ----------------------------------------------------------------------------
def _concat_pe_kernel(x_ref, pe_ref, out_ref, *, dx: int):
    # out[..., :dx] <- x tile (straight load -> sliced store)
    # out[..., dx:] <- PE tile, replicated across the batch-tile dim.  The PE
    #                  BlockSpec ignores the (inner, fastest) batch grid axis,
    #                  so its DMA is issued once per seq tile and reused.
    tb, ts = out_ref.shape[0], out_ref.shape[1]
    out_ref[:, :, :dx] = x_ref[...]
    pe_tile = pe_ref[...]                       # already x.dtype (cast on host)
    out_ref[:, :, dx:] = jnp.broadcast_to(
        pe_tile[None, :, :], (tb, ts, pe_tile.shape[-1]))


# ----------------------------------------------------------------------------
# Host-side helpers
# ----------------------------------------------------------------------------
def _build_pe(seq_len: int, d_model: int, factor: float, dtype=jnp.float32):
    """Mirrors the PyTorch buffer built in PositionalEncoding.__init__,
    sliced to the actual sequence length (forward only uses pe[:, :S])."""
    if d_model % 2 != 0:
        # The PyTorch module has the same limitation (shape mismatch on 1::2).
        raise ValueError("d_model must be even (matches the PyTorch module).")
    position = jnp.arange(seq_len, dtype=jnp.float32)[:, None]
    div_term = jnp.exp(jnp.arange(0, d_model, 2, dtype=jnp.float32)
                       * (-math.log(10000.0) / float(d_model)))
    angles = position * div_term                      # (S, d_model // 2)
    pe = jnp.zeros((seq_len, d_model), jnp.float32)
    pe = pe.at[:, 0::2].set(jnp.sin(angles))
    pe = pe.at[:, 1::2].set(jnp.cos(angles))
    return (pe * jnp.float32(factor)).astype(dtype)


def _vmem_budget_and_limit():
    """Generation-aware VMEM budget (double-buffered working-set target) and
    a matching scoped-VMEM limit to pass to the compiler."""
    try:
        capacity = int(pltpu.get_tpu_info().vmem_capacity_bytes)
    except Exception:
        capacity = 64 << 20            # conservative fallback (v7x per-TC VMEM)
    budget = (capacity * 3) // 8       # ~24 MiB on v7x, ~48 MiB on v5e/v6e
    limit = capacity // 2              # ~32 MiB on v7x, ~64 MiB on v5e/v6e
    return budget, limit


def _choose_tiles(B: int, S: int, Dx: int, d_model: int,
                  itemsize: int, vmem_budget_bytes: int):
    """Pick (tile_b, tile_s): grow the seq tile first (up to S), then grow the
    batch tile with the remaining budget.  No artificial caps, no divisor
    search — Pallas masks the ragged last tile on both axes."""
    d_out = Dx + d_model
    sublane = {1: 32, 2: 16, 4: 8}.get(itemsize, 8)

    # Double-buffered bytes per sequence row at tile_b == 1
    # (x in + out + pe, each x2 for pipelining).
    row_bytes = 2 * itemsize * (Dx + d_out + d_model)
    tile_s = max(sublane, vmem_budget_bytes // max(1, row_bytes))

    if tile_s >= S:
        tile_s = S
        per_batch_bytes = 2 * itemsize * S * (Dx + d_out)
        pe_bytes = 2 * itemsize * S * d_model
        tile_b = max(1, (vmem_budget_bytes - pe_bytes) // max(1, per_batch_bytes))
        tile_b = min(tile_b, B)
    else:
        tile_s = (tile_s // sublane) * sublane   # keep sublane packing clean
        tile_b = 1
    return int(tile_b), int(tile_s)


# ----------------------------------------------------------------------------
# Public wrapper
# ----------------------------------------------------------------------------
def positional_encoding_concat(x, d_model: int, factor: float = 0.1, pe=None,
                               *, tile_s=None, tile_b=None):
    """x: (B, S, Dx) -> (B, S, Dx + d_model): concat of x with the PE buffer.

    Optional tile_s / tile_b overrides (for testing the ragged-tile path);
    if tile_s < S it must be a multiple of the dtype's sublane packing."""
    B, S, Dx = x.shape
    d_out = Dx + d_model
    itemsize = jnp.dtype(x.dtype).itemsize

    if pe is None:
        pe = _build_pe(S, d_model, factor, x.dtype)
    else:
        pe = jnp.asarray(pe)
        if pe.ndim == 3:                  # PyTorch-style (1, max_len, d_model)
            pe = pe[0]
        if pe.shape[0] < S or pe.shape[-1] != d_model:
            raise ValueError(
                f"pe shape {pe.shape} incompatible with S={S}, d_model={d_model}")
        pe = pe[:S].astype(x.dtype)       # cast on host, never in-kernel

    budget, vmem_limit = _vmem_budget_and_limit()
    auto_b, auto_s = _choose_tiles(B, S, Dx, d_model, itemsize, budget)
    tile_s = auto_s if tile_s is None else min(int(tile_s), S)
    tile_b = auto_b if tile_b is None else min(int(tile_b), B)

    n_s = pl.cdiv(S, tile_s)
    n_b = pl.cdiv(B, tile_b)

    kernel = functools.partial(_concat_pe_kernel, dx=Dx)

    cost = pl.CostEstimate(
        flops=0,
        transcendentals=0,
        bytes_accessed=int(itemsize * (B * S * Dx + S * d_model + B * S * d_out)),
    )

    return pl.pallas_call(
        kernel,
        out_shape=jax.ShapeDtypeStruct((B, S, d_out), x.dtype),
        # Batch is the inner (fastest) grid axis so the PE block index stays
        # constant across consecutive steps -> its DMA is skipped/reused.
        grid=(n_s, n_b),
        in_specs=[
            pl.BlockSpec((tile_b, tile_s, Dx), lambda s, b: (b, s, 0)),
            pl.BlockSpec((tile_s, d_model), lambda s, b: (s, 0)),
        ],
        out_specs=pl.BlockSpec((tile_b, tile_s, d_out), lambda s, b: (b, s, 0)),
        compiler_params=pltpu.CompilerParams(
            dimension_semantics=("parallel", "parallel"),
            vmem_limit_bytes=int(vmem_limit)),
        cost_estimate=cost,
    )(x, pe)


# ----------------------------------------------------------------------------
# Pure-JAX reference mirroring the PyTorch module exactly
# ----------------------------------------------------------------------------
def _reference(x, d_model, factor=0.1, max_len=5000):
    position = jnp.arange(0, max_len, dtype=jnp.float32)[:, None]
    div_term = jnp.exp(jnp.arange(0, d_model, 2, dtype=jnp.float32)
                       * -(math.log(10000.0) / d_model))
    pe = jnp.zeros((max_len, d_model), dtype=jnp.float32)
    pe = pe.at[:, 0::2].set(jnp.sin(position * div_term))
    pe = pe.at[:, 1::2].set(jnp.cos(position * div_term))
    pe = pe[None] * factor
    B, S, _ = x.shape
    b = jnp.broadcast_to(pe[:, :S], (B, S, d_model))
    return jnp.concatenate([x, b], axis=2)


if __name__ == "__main__":
    key = jax.random.PRNGKey(0)
    d_model = 32
    factor = 0.1

    # --- Test 1: demo shapes, f32, auto tiling (single full-size block) -----
    B, S, Dx = 2, 8, 32
    x = jax.random.normal(key, (B, S, Dx), dtype=jnp.float32)
    out = jax.block_until_ready(
        positional_encoding_concat(x, d_model=d_model, factor=factor))
    ref = _reference(x, d_model, factor)
    assert out.shape == (B, S, Dx + d_model), out.shape
    assert jnp.allclose(out, ref, atol=1e-5, rtol=1e-5), "mismatch (test 1)"

    # --- Test 2: ragged seq AND batch tiles (S % tile_s != 0, B % tile_b != 0)
    B2, S2 = 3, 20
    x2 = jax.random.normal(jax.random.PRNGKey(1), (B2, S2, Dx), jnp.float32)
    out2 = jax.block_until_ready(
        positional_encoding_concat(x2, d_model=d_model, factor=factor,
                                   tile_s=8, tile_b=2))
    ref2 = _reference(x2, d_model, factor)
    assert jnp.allclose(out2, ref2, atol=1e-5, rtol=1e-5), "mismatch (test 2)"

    # --- Test 3: bf16 input (dtype-aware sizing + host-side pe cast) --------
    x3 = x.astype(jnp.bfloat16)
    out3 = jax.block_until_ready(
        positional_encoding_concat(x3, d_model=d_model, factor=factor))
    ref3 = _reference(x3.astype(jnp.float32), d_model, factor)
    assert out3.dtype == jnp.bfloat16
    assert jnp.allclose(out3.astype(jnp.float32), ref3, atol=1e-2), \
        "mismatch (test 3)"

    # TODO(synk): nn.Dropout is declared in __init__ but never applied in
    # forward(), so it is intentionally not implemented.
    print("KERNEL_OK")
</pallas_src>

<mosaic_0001>
module attributes {stable_mosaic.version = 11 : i64} {
  func.func @_concat_pe_kernel(%arg0: i32, %arg1: i32, %arg2: memref<2x8x32xf32, #tpu.memory_space<vmem>>, %arg3: memref<8x32xf32, #tpu.memory_space<vmem>>, %arg4: memref<2x8x64xf32, #tpu.memory_space<vmem>>) attributes {dimension_semantics = [#tpu.dimension_semantics<parallel>, #tpu.dimension_semantics<parallel>], iteration_bounds = array<i64: 1, 1>, scalar_prefetch = 0 : i64, scratch_operands = 0 : i64, tpu.core_type = #tpu.core_type<tc>, window_params = [{transform_indices = @transform_0, window_bounds = array<i64: 2, 8, 32>}, {transform_indices = @transform_1, window_bounds = array<i64: 8, 32>}, {transform_indices = @transform_2, window_bounds = array<i64: 2, 8, 64>}]} {
    %c0 = arith.constant 0 : index
    %c0_0 = arith.constant 0 : index
    %c0_1 = arith.constant 0 : index
    %0 = vector.load %arg2[%c0, %c0_0, %c0_1] : memref<2x8x32xf32, #tpu.memory_space<vmem>>, vector<2x8x32xf32>
    %c0_2 = arith.constant 0 : index
    %c0_3 = arith.constant 0 : index
    %c0_4 = arith.constant 0 : index
    %1 = vector.load %arg4[%c0_2, %c0_3, %c0_4] : memref<2x8x64xf32, #tpu.memory_space<vmem>>, vector<2x8x32xf32>
    tpu.vector_store %arg4[%c0_2, %c0_3, %c0_4], %0 {strides = array<i32>} : memref<2x8x64xf32, #tpu.memory_space<vmem>>, vector<2x8x32xf32>,
    %c0_5 = arith.constant 0 : index
    %c0_6 = arith.constant 0 : index
    %2 = vector.load %arg3[%c0_5, %c0_6] : memref<8x32xf32, #tpu.memory_space<vmem>>, vector<8x32xf32>
    %3 = vector.shape_cast %2 : vector<8x32xf32> to vector<1x8x32xf32>
    %4 = vector.shape_cast %3 : vector<1x8x32xf32> to vector<1x8x32xf32>
    %5 = vector.broadcast %4 : vector<1x8x32xf32> to vector<2x8x32xf32>
    %c0_7 = arith.constant 0 : index
    %c0_8 = arith.constant 0 : index
    %c32 = arith.constant 32 : index
    %6 = vector.load %arg4[%c0_7, %c0_8, %c32] : memref<2x8x64xf32, #tpu.memory_space<vmem>>, vector<2x8x32xf32>
    tpu.vector_store %arg4[%c0_7, %c0_8, %c32], %5 {strides = array<i32>} : memref<2x8x64xf32, #tpu.memory_space<vmem>>, vector<2x8x32xf32>,
    return
  }
  func.func @transform_0(%arg0: i32, %arg1: i32) -> (i32, i32, i32) {
    %c0_i32 = arith.constant 0 : i32
    %c0_i32_0 = arith.constant 0 : i32
    return %arg1, %arg0, %c0_i32 : i32, i32, i32
  }
  func.func @transform_1(%arg0: i32, %arg1: i32) -> (i32, i32) {
    %c0_i32 = arith.constant 0 : i32
    %c0_i32_0 = arith.constant 0 : i32
    return %arg0, %c0_i32 : i32, i32
  }
  func.func @transform_2(%arg0: i32, %arg1: i32) -> (i32, i32, i32) {
    %c0_i32 = arith.constant 0 : i32
    %c0_i32_0 = arith.constant 0 : i32
    return %arg1, %arg0, %c0_i32 : i32, i32, i32
  }
}

</mosaic_0001>

<bundles_post_ra>
// kernel: tpu_custom_call.1
= control target key start
LH: loop header
LB: loop body
LE: loop exit
PB: predicated region body
PF: predicated region fallthrough
CT: control target
= control target key end

     0   :  { %7 = vsyncpa [#allocation3], 0  ;;  %s210_s0 = inlined_call_operand.hbm [shape: f32[2,8,32], index: 0, kind: input, shape index: {}]   ;;  %s211_s1 = inlined_call_operand.hbm [shape: f32[8,32], index: 1, kind: input, shape index: {}]   ;;  %s212_s2 = inlined_call_operand.hbm [shape: f32[2,8,64], index: 2, kind: output, shape index: {}]  }
   0x1   :  { %8 = vsyncpa [#allocation6], 0 }
   0x2   :  { %9 = vsyncpa [#allocation4], 0  ;;  %s147_s9 = smov [#allocation2]   ;;  %s75_s13 = scalar_lea.hbm %s210_s0, 256 }
   0x3   :  { %s15_s10 = sshll.u32 %s147_s9, 4  ;;  %p76_p0 = scmp.ne.s32.totalorder %s210_s0, %s75_s13  ;;  %s16_s10 = int_to_ptr.vmem [resolvable:$true] %s15_s10 }
   0x4   :  { %p79_p1 = scmp.lt.u32.totalorder %s75_s13, %s210_s0 }
   0x6   :  { %p81_p2 = pnand %p79_p1, %p76_p0 }
   0x8   :  { %84 = shalt.err (!%p81_p2)
}
   0x9   :  { %s85_s18 = scalar_lea.vmem %s16_s10, 256  ;;  %p90_p4 = scmp.lt.s32.totalorder %s16_s10, %s16_s10 }
   0xa   :  { %p86_p3 = scmp.ne.s32.totalorder %s16_s10, %s85_s18  ;;  %p91_p5 = scmp.lt.s32.totalorder %s85_s18, %s85_s18 }
   0xc   :  { %p92_p6 = por %p91_p5, %p90_p4 }
   0xe   :  { %p93_p7 = pnand %p92_p6, %p86_p3 }
  0x10   :  { %96 = shalt.err (!%p93_p7)
}
  0x11   :  { %s148_s19 = smov 128   ;;  %s149_s20 = smov 8  }
  0x12   :  { %21 = dma.hbm_to_vmem [thread:$0]  %s210_s0, 256, %s16_s10, [#allocation3], %s148_s19, %s148_s19, %s149_s20  }
  0x13   :  { %s150_s23 = smov [#allocation5]   ;;  %s97_s27 = scalar_lea.hbm %s211_s1, 128 }
  0x14   :  { %s28_s24 = sshll.u32 %s150_s23, 4  ;;  %p98_p8 = scmp.ne.s32.totalorder %s211_s1, %s97_s27  ;;  %s29_s24 = int_to_ptr.vmem [resolvable:$true] %s28_s24 }
  0x15   :  { %p101_p9 = scmp.lt.u32.totalorder %s97_s27, %s211_s1 }
  0x17   :  { %p103_p10 = pnand %p101_p9, %p98_p8 }
  0x19   :  { %106 = shalt.err (!%p103_p10)
}
  0x1a   :  { %s107_s4 = scalar_lea.vmem %s29_s24, 128  ;;  %p112_p12 = scmp.lt.s32.totalorder %s29_s24, %s29_s24 }
  0x1b   :  { %p108_p11 = scmp.ne.s32.totalorder %s29_s24, %s107_s4  ;;  %p113_p13 = scmp.lt.s32.totalorder %s107_s4, %s107_s4 }
  0x1d   :  { %p114_p0 = por %p113_p13, %p112_p12 }
  0x1f   :  { %p115_p1 = pnand %p114_p0, %p108_p11 }
  0x21   :  { %118 = shalt.err (!%p115_p1)
}
  0x22   :  { %31 = dma.hbm_to_vmem [thread:$0]  %s211_s1, 128, %s29_s24, [#allocation6]  }
  0x23   :  { %141 = dma.done.wait [#allocation3], 256  }
  0x24   :  { %142 = vsyncadd [#allocation3], 4294967040 }
  0x25   :  { %143 = dma.done.wait [#allocation6], 128  }
  0x26   :  { %144 = vsyncadd [#allocation6], 4294967168  ;;  %vm40_vm0 = vcmask 261120   ;;  %v43_v0 = vld [vmem:[#allocation5] sm:$0xff]  ;;  %v38_v1 = vld [vmem:[#allocation2] sm:$0xff]  ;;  %s151_s6 = smov 32  }
  0x27   :  { %v39_v2 = vld [vmem:[#allocation2 + $0x8] sm:$0xff]  ;;  %45 = vrot.lane.b32.xlu0 %v43_v0, %s151_s6  ;;  %41 = vst.msk [vmem:[#allocation7] sm:$0xff] %vm40_vm0, %v38_v1  ;;  %s152_s7 = smov [#allocation7]   ;;  %vm48_vm1 = vcmask 523520  }
  0x28   :  { %42 = vst.msk [vmem:[#allocation7 + $0x8] sm:$0xff] %vm40_vm0, %v39_v2  ;;  %s56_s8 = sshll.u32 %s152_s7, 4  ;;  %s57_s8 = int_to_ptr.vmem [resolvable:$true] %s56_s8 }
  0x29   :  { %s119_s1 = scalar_lea.vmem %s57_s8, 256  ;;  %p124_p3 = scmp.lt.s32.totalorder %s57_s8, %s57_s8 }
  0x2a   :  { %p120_p2 = scmp.ne.s32.totalorder %s57_s8, %s119_s1  ;;  %p125_p4 = scmp.lt.s32.totalorder %s119_s1, %s119_s1 }
  0x2c   :  { %p126_p5 = por %p125_p4, %p124_p3 }
  0x2e   :  { %p127_p6 = pnand %p126_p5, %p120_p2 }
  0x99   :  { %v46_v3 = vpop.permute.xlu0 %45 }
  0x9a   :  { %49 = vst.msk [vmem:[#allocation7] sm:$0xff] %vm48_vm1, %v46_v3  ;;  %50 = vst.msk [vmem:[#allocation7 + $0x8] sm:$0xff] %vm48_vm1, %v46_v3 }
  0x9b   :  { %130 = shalt.err (!%p127_p6)
}
  0x9c   :  { %s131_s11 = scalar_lea.hbm %s212_s2, 256 }
  0x9d   :  { %p132_p7 = scmp.ne.s32.totalorder %s212_s2, %s131_s11  ;;  %p135_p8 = scmp.lt.u32.totalorder %s131_s11, %s212_s2 }
  0x9f   :  { %p137_p9 = pnand %p135_p8, %p132_p7 }
  0xa1   :  { %140 = shalt.err (!%p137_p9)
}
  0xa2   :  { %62 = dma.vmem_to_hbm [thread:$0]  %s57_s8, 256, %s212_s2, [#allocation4], %s148_s19, %s148_s19, %s149_s20  }
  0xa3   :  { %145 = dma.done.wait [#allocation4], 256  }
  0xa4   :  { %146 = vsyncadd [#allocation4], 4294967040 }
  0xa5   :  { %66 = vsyncpa [#allocation3], 1 }
  0xa6   :  { %67 = vsyncpa [#allocation6], 1 }
  0xa7   :  { %68 = vsyncpa [#allocation4], 1 }

</bundles_post_ra>
